<compile_context>
chip_gen: v5e
topology: v5e:2x2
jax: 0.10.0
libtpu: 0.0.40
codegen_flags: <defaults>
</compile_context>

<pallas_src>
import jax
import jax.numpy as jnp
from jax import lax
from jax.experimental import pallas as pl
from jax.experimental.pallas import tpu as pltpu


def _round_up(x, m):
    return (x + m - 1) // m * m


def highlight_kernel(x_ref, mask_ref, w_ref, b_ref, out_ref):
    x = x_ref[...]        # (TM, D) f32 row tile
    w = w_ref[...]        # (1, D)  f32 conv weight (constant block, not re-fetched)
    mask = mask_ref[...]  # (1, TM) f32

    # Conv1D(k=1, out_dim=1): contract the LAST dims directly (rhs-transposed form).
    # No transpose of x; result is a lane-dense (1, TM) row.
    logits = lax.dot_general(
        w, x,
        dimension_numbers=(((1,), (1,)), ((), ())),
        preferred_element_type=jnp.float32,
    )                                      # (1, TM)
    logits = logits + b_ref[0]             # scalar bias straight from SMEM

    # mask_logits — stays in f32 (-1e30 is not representable in bf16).
    logits = logits + (1.0 - mask) * (-1e30)

    # Stable sigmoid on the EUP: tanh(-5e29) == -1 exactly, so masked positions
    # become 0.0 with no inf intermediate.
    out_ref[...] = 0.5 * (jnp.tanh(0.5 * logits) + 1.0)


def highlight_layer(x, mask, w, b, *, tm_target=2048):
    """x: (B, L, D), mask: (B, L), w: (1, D) == Conv1d weight[:, :, 0], b: (1,) -> (B, L)."""
    B, L, D = x.shape
    N = B * L

    # --- row-tile sizing: wide tiles for a bandwidth-bound op, VMEM-capped ---
    lane_d = _round_up(max(D, 1), 128)          # lanes pad D up to 128 in VMEM
    bytes_per_row = lane_d * 4
    vmem_per_buf = 8 * 1024 * 1024              # conservative per-buffer cap (v7x: 64 MiB VMEM)
    tm_cap = max(256, (vmem_per_buf // bytes_per_row) // 256 * 256)
    tm = min(tm_target, tm_cap)
    # Prefer >=2 grid steps so v7x's two TensorCores both get work (no-op on v5e/v6e).
    tm = min(tm, max(128, _round_up(pl.cdiv(N, 2), 128)))
    n_pad = _round_up(N, tm)
    grid = n_pad // tm

    x_flat = x.reshape(N, D).astype(jnp.float32)
    mask_row = mask.reshape(1, N).astype(jnp.float32)
    if n_pad != N:
        x_flat = jnp.pad(x_flat, ((0, n_pad - N), (0, 0)))
        mask_row = jnp.pad(mask_row, ((0, 0), (0, n_pad - N)))   # pad rows are masked out

    w2 = w.reshape(1, D).astype(jnp.float32)
    b1 = b.reshape(1).astype(jnp.float32)

    # Explicit VMEM limit (double-buffered x tile dominates); clamp to a sane range.
    vmem_need = 2 * tm * bytes_per_row + 2 * 2 * (8 * tm * 4) + 8 * bytes_per_row
    vmem_limit = int(min(max(_round_up(2 * vmem_need, 1 << 20), 4 << 20), 32 << 20))

    out = pl.pallas_call(
        highlight_kernel,
        out_shape=jax.ShapeDtypeStruct((1, n_pad), jnp.float32),
        grid_spec=pltpu.PrefetchScalarGridSpec(
            num_scalar_prefetch=0,
            grid=(grid,),
            in_specs=[
                pl.BlockSpec((tm, D), lambda i: (i, 0)),             # x row tile
                pl.BlockSpec((1, tm), lambda i: (0, i)),             # mask row tile
                pl.BlockSpec((1, D), lambda i: (0, 0)),              # conv weight (constant)
                pl.BlockSpec(memory_space=pltpu.MemorySpace.SMEM),   # bias scalar in SMEM
            ],
            out_specs=pl.BlockSpec((1, tm), lambda i: (0, i)),       # wide lane-dense store
        ),
        compiler_params=pltpu.CompilerParams(
            dimension_semantics=("parallel",),
            vmem_limit_bytes=vmem_limit,
        ),
    )(x_flat, mask_row, w2, b1)

    return out[0, :N].reshape(B, L)


def reference_jax(x, mask, w, b):
    # Pure-JAX mirror of the PyTorch forward (Conv1D k=1 == per-position linear).
    logits = jnp.einsum("bld,od->blo", x, w)[..., 0] + b[0]       # (B, L)
    logits = logits + (1.0 - mask) * (-1e30)
    return 1.0 / (1.0 + jnp.exp(-logits))


if __name__ == "__main__":
    B, L, D = 2, 128, 32   # small shapes consistent with the module

    key = jax.random.PRNGKey(0)
    kx, kw, kb = jax.random.split(key, 3)

    x = jax.random.normal(kx, (B, L, D), dtype=jnp.float32)
    # mask: 1.0 = valid position, 0.0 = padded; pad the last 16 positions of batch 1.
    mask = jnp.ones((B, L), dtype=jnp.float32).at[1, -16:].set(0.0)

    w = (0.1 * jax.random.normal(kw, (1, D))).astype(jnp.float32)   # Conv1d weight[:, :, 0]
    b = (0.1 * jax.random.normal(kb, (1,))).astype(jnp.float32)     # Conv1d bias

    out = jax.block_until_ready(highlight_layer(x, mask, w, b))
    ref = reference_jax(x, mask, w, b)

    assert out.shape == (B, L)
    assert bool(jnp.all(jnp.isfinite(out)))
    assert jnp.allclose(out, ref, atol=1e-5, rtol=1e-5), "mismatch vs pure-JAX reference"
    # masked positions must be driven to (near-)zero probability
    assert float(jnp.max(out[1, -16:])) < 1e-12

    # TODO(synk): HighLightLayer.compute_loss (weighted BCE helper) is not part of the
    # forward pass and is left to plain JAX if needed.
    print("KERNEL_OK")
</pallas_src>

<mosaic_0001>
module attributes {stable_mosaic.version = 11 : i64} {
  func.func @highlight_kernel(%arg0: i32, %arg1: memref<128x32xf32, #tpu.memory_space<vmem>>, %arg2: memref<1x128xf32, #tpu.memory_space<vmem>>, %arg3: memref<1x32xf32, #tpu.memory_space<vmem>>, %arg4: memref<1xf32, #tpu.memory_space<smem>>, %arg5: memref<1x128xf32, #tpu.memory_space<vmem>>) attributes {dimension_semantics = [#tpu.dimension_semantics<parallel>], iteration_bounds = array<i64: 2>, scalar_prefetch = 0 : i64, scratch_operands = 0 : i64, tpu.core_type = #tpu.core_type<tc>, window_params = [{transform_indices = @transform_0, window_bounds = array<i64: 128, 32>}, {transform_indices = @transform_1, window_bounds = array<i64: 1, 128>}, {pipeline_mode = #tpu.pipeline_mode<synchronous>, transform_indices = @transform_2, window_bounds = array<i64: 1, 32>}, {transform_indices = @transform_3, window_bounds = array<i64: 1>}, {transform_indices = @transform_4, window_bounds = array<i64: 1, 128>}]} {
    %c0 = arith.constant 0 : index
    %c0_0 = arith.constant 0 : index
    %0 = vector.load %arg1[%c0, %c0_0] : memref<128x32xf32, #tpu.memory_space<vmem>>, vector<128x32xf32>
    %c0_1 = arith.constant 0 : index
    %c0_2 = arith.constant 0 : index
    %1 = vector.load %arg3[%c0_1, %c0_2] : memref<1x32xf32, #tpu.memory_space<vmem>>, vector<1x32xf32>
    %c0_3 = arith.constant 0 : index
    %c0_4 = arith.constant 0 : index
    %2 = vector.load %arg2[%c0_3, %c0_4] : memref<1x128xf32, #tpu.memory_space<vmem>>, vector<1x128xf32>
    %cst = arith.constant dense<0.000000e+00> : vector<1x128xf32>
    %3 = tpu.matmul %1, %0, %cst {dimension_numbers = #tpu.dot_dimension_numbers<[1], [1], [0], [0], [0, 0, 1, 0], [], []>} : vector<1x32xf32>, vector<128x32xf32>, vector<1x128xf32> -> vector<1x128xf32>
    %c0_5 = arith.constant 0 : index
    %4 = memref.load %arg4[%c0_5] : memref<1xf32, #tpu.memory_space<smem>>
    %5 = vector.broadcast %4 : f32 to vector<1x128xf32>
    %6 = arith.addf %3, %5 : vector<1x128xf32>
    %cst_6 = arith.constant 1.000000e+00 : f32
    %7 = vector.broadcast %cst_6 : f32 to vector<1x128xf32>
    %8 = arith.subf %7, %2 : vector<1x128xf32>
    %cst_7 = arith.constant -1.000000e+30 : f32
    %9 = vector.broadcast %cst_7 : f32 to vector<1x128xf32>
    %10 = arith.mulf %8, %9 : vector<1x128xf32>
    %11 = arith.addf %6, %10 : vector<1x128xf32>
    %cst_8 = arith.constant 5.000000e-01 : f32
    %12 = vector.broadcast %cst_8 : f32 to vector<1x128xf32>
    %13 = arith.mulf %12, %11 : vector<1x128xf32>
    %14 = math.tanh %13 : vector<1x128xf32>
    %cst_9 = arith.constant 1.000000e+00 : f32
    %15 = vector.broadcast %cst_9 : f32 to vector<1x128xf32>
    %16 = arith.addf %14, %15 : vector<1x128xf32>
    %cst_10 = arith.constant 5.000000e-01 : f32
    %17 = vector.broadcast %cst_10 : f32 to vector<1x128xf32>
    %18 = arith.mulf %17, %16 : vector<1x128xf32>
    %c0_11 = arith.constant 0 : index
    %c0_12 = arith.constant 0 : index
    %19 = vector.load %arg5[%c0_11, %c0_12] : memref<1x128xf32, #tpu.memory_space<vmem>>, vector<1x128xf32>
    tpu.vector_store %arg5[%c0_11, %c0_12], %18 {strides = array<i32>} : memref<1x128xf32, #tpu.memory_space<vmem>>, vector<1x128xf32>,
    return
  }
  func.func @transform_0(%arg0: i32) -> (i32, i32) {
    %c0_i32 = arith.constant 0 : i32
    %c0_i32_0 = arith.constant 0 : i32
    return %arg0, %c0_i32 : i32, i32
  }
  func.func @transform_1(%arg0: i32) -> (i32, i32) {
    %c0_i32 = arith.constant 0 : i32
    %c0_i32_0 = arith.constant 0 : i32
    return %c0_i32, %arg0 : i32, i32
  }
  func.func @transform_2(%arg0: i32) -> (i32, i32) {
    %c0_i32 = arith.constant 0 : i32
    %c0_i32_0 = arith.constant 0 : i32
    %c0_i32_1 = arith.constant 0 : i32
    return %c0_i32, %c0_i32_0 : i32, i32
  }
  func.func @transform_3(%arg0: i32) -> i32 {
    %c0_i32 = arith.constant 0 : i32
    %c0_i32_0 = arith.constant 0 : i32
    return %c0_i32 : i32
  }
  func.func @transform_4(%arg0: i32) -> (i32, i32) {
    %c0_i32 = arith.constant 0 : i32
    %c0_i32_0 = arith.constant 0 : i32
    return %c0_i32, %arg0 : i32, i32
  }
}

</mosaic_0001>

<bundles_post_ra>
// kernel: tpu_custom_call.1
= control target key start
LH: loop header
LB: loop body
LE: loop exit
PB: predicated region body
PF: predicated region fallthrough
CT: control target
= control target key end

     0   :  { %s674_s0 = inlined_call_operand.vmem [shape: f32[256,32], index: 0, kind: input, shape index: {}]   ;;  %s675_s1 = inlined_call_operand.vmem [shape: f32[1,256], index: 1, kind: input, shape index: {}]   ;;  %s676_s2 = inlined_call_operand.vmem [shape: f32[1,32], index: 2, kind: input, shape index: {}]   ;;  %s677_s3 = inlined_call_operand.<no memory space> [shape: f32[1], index: 3, kind: input, shape index: {}]   ;;  %s678_s4 = inlined_call_operand.hbm [shape: f32[1,256], index: 4, kind: output, shape index: {}]  }
   0x1   :  { %9 = sst [smem:[#allocation2]] %s677_s3 }
   0x2   :  { %10 = vsyncpa [#allocation4], 0 }
   0x3   :  { %12 = vsyncpa [#allocation4 + $0x1], 0  ;;  %s547_s17 = smov 0   ;;  %s549_s18 = smov 0  }
   0x4   :  { %s551_s19 = smov 0   ;;  %s553_s20 = smov 0  }
   0x5 LB: > { %s568_s3 = sadd.s32 4294967295, %s517_s20   ;;  %s389_s21 = sadd.s32 4294967294, %s517_s20   ;;  %s517_s20 = sphi %s553_s20, %s684_s20   ;;  %s513_s19 = sphi %s551_s19, %s683_s19   ;;  %s509_s18 = sphi %s549_s18, %s682_s18   ;;  %s505_s17 = sphi %s547_s17, %s681_s17  }
   0x6   : > { %s572_s22 = sadd.s32 1, %s517_s20   ;;  %s119_s23 = sadd.s32 1, %s513_s19 }
   0x7   : > { %s116_s24 = ssub.s32 %s517_s20, %s572_s22  ;;  %p129_p0 = scmp.ne.s32.totalorder %s513_s19, %s509_s18 }
   0x8   : > { %p117_p1 = scmp.eq.s32.totalorder %s116_s24, 0  ;;  %p130_p2 = scmp.eq.s32.totalorder %s568_s3, 1 }
   0x9   : > { %p135_p3 = scmp.ne.s32.totalorder %s509_s18, %s505_s17  ;;  %p136_p4 = scmp.eq.s32.totalorder %s389_s21, 1 }
   0xa   : > { %s583_s25 = scalar_select %p117_p1, %s513_s19, %s119_s23  }
   0xb   : > { %p585_p5 = por %p130_p2, %p129_p0  ;;  %p589_p6 = por %p136_p4, %p135_p3 }
   0xc   : > { %p392_p7 = scmp.ge.s32.totalorder %s517_s20, 1  ;;  %p175_p8 = scmp.lt.s32.totalorder %s517_s20, 3 }
   0xe   : > { %p176_p9 = pnand %p392_p7, %p175_p8 }
   0xf   : > { %s393_s28 = sshll.u32 (!%p176_p9), %s568_s3, 4  ;;  %p209_p11 = scmp.lt.s32.totalorder (!%p176_p9), %s568_s3, 1 }
  0x10   : > { %179 = sbr.rel (%p176_p9) target bundleno = 234 (0xea), region = 36  ;;  %p204_p10 = scmp.lt.s32.totalorder (!%p176_p9), %s393_s28, 31 }
  0x11   : > { %s230_s13 = sld [smem:[#allocation2]] (!%p176_p9)  ;;  %s201_s14 = sand.u32 (!%p176_p9), 1, %s509_s18  }
  0x12   : > { %s321_s21 = scalar_lea.hbm (!%p176_p9), %s678_s4, %s568_s3  ;;  %s202_s23 = scalar_lea.vmem (!%p176_p9), [#allocation3], %s201_s14 }
  0x13   : > { %s323_s24 = sshll.u32 (!%p176_p9), %s202_s23, 4  ;;  %s324_s24 = int_to_ptr.vmem [resolvable:$true] %s323_s24 }
  0x15   : > { %s686_s28 = smov (!%p204_p10, %s393_s28), 31  ;;  %vm232_vm0 = vcmask 261120   ;;  %v228_v16 = vld [vmem:[%s676_s2] sm:$0x1] }
  0x16   : > { %s394_s29 = sshll.u32 %s686_s28, 3  ;;  %s325_s28 = sshll.u32 %s321_s21, 4  ;;  %s326_s28 = int_to_ptr.hbm [resolvable:$true] %s325_s28 }
  0x17   : > { %s599_s6 = scalar_lea.vmem %s674_s0, %s394_s29  ;;  %v231_v19 = vstv %s230_s13  ;;  %s313_s29 = scalar_lea.sflag [#allocation4], %s201_s14 }
  0x18   : > { %v227_v0 = vld [vmem:[%s599_s6 + $0x78] sm:$0xff]  ;;  %v226_v1 = vld [vmem:[%s599_s6 + $0x70] sm:$0xff]  ;;  %v225_v2 = vld [vmem:[%s599_s6 + $0x68] sm:$0xff]  ;;  %s210_s9 = scalar_select %p209_p11, %s568_s3, 1 }
  0x19   : > { %395 = vmatpush.xpose.msk.msra.mxu0 %vm232_vm0, %v227_v0  ;;  %v224_v3 = vld [vmem:[%s599_s6 + $0x60] sm:$0xff]  ;;  %v223_v4 = vld [vmem:[%s599_s6 + $0x58] sm:$0xff]  ;;  %v222_v5 = vld [vmem:[%s599_s6 + $0x50] sm:$0xff]  ;;  %s469_s30 = sshra.s32 %s326_s28, 4  ;;  %s475_s3 = scalar_lea.hbm %s678_s4, 2  ;;  %s470_s30 = int_to_ptr.hbm [resolvable:$true] %s469_s30 }
  0x1a   : > { %v221_v6 = vld [vmem:[%s599_s6 + $0x48] sm:$0xff]  ;;  %v220_v7 = vld [vmem:[%s599_s6 + $0x40] sm:$0xff]  ;;  %v219_v8 = vld [vmem:[%s599_s6 + $0x38] sm:$0xff]  ;;  %s211_s12 = scalar_lea.vmem %s675_s1, %s210_s9  ;;  %s471_s5 = scalar_lea.hbm %s470_s30, 1 }
  0x1b   : > { %v218_v9 = vld [vmem:[%s599_s6 + $0x30] sm:$0xff]  ;;  %v217_v10 = vld [vmem:[%s599_s6 + $0x28] sm:$0xff]  ;;  %v216_v11 = vld [vmem:[%s599_s6 + $0x20] sm:$0xff]  ;;  %p472_p12 = scmp.ne.s32.totalorder %s470_s30, %s471_s5  ;;  %p476_p1 = scmp.lt.s32.totalorder %s470_s30, %s678_s4 }
  0x1c   : > { %v215_v12 = vld [vmem:[%s599_s6 + $0x18] sm:$0xff]  ;;  %v214_v13 = vld [vmem:[%s599_s6 + $0x10] sm:$0xff]  ;;  %v213_v14 = vld [vmem:[%s599_s6 + $0x8] sm:$0xff]  ;;  %p477_p2 = scmp.lt.s32.totalorder %s475_s3, %s471_s5 }
  0x1d   : > { %396 = vmatpush.xpose.msk.msra.mxu0 %vm232_vm0, %v226_v1  ;;  %v212_v15 = vld [vmem:[%s599_s6] sm:$0xff]  ;;  %p473_p13 = pnand %p472_p12, %p585_p5 }
  0x1e   : > { %v229_v17 = vld [vmem:[%s211_s12] sm:$0x1]  ;;  %p478_p3 = por %p477_p2, %p476_p1 }
  0x1f   : > { %v304_v18 = vsub.f32 1.0, %v229_v17  ;;  %p474_p0 = pneg %p473_p13 }
  0x21   : > { %397 = vmatpush.xpose.msk.msra.mxu0 %vm232_vm0, %v225_v2  ;;  %v305_v20 = vmul.f32 -1e+30, %v304_v18  ;;  %p479_p4 = pnand %p478_p3, %p474_p0 }
  0x25   : > { %398 = vmatpush.xpose.msk.msra.mxu0 %vm232_vm0, %v224_v3 }
  0x29   : > { %399 = vmatpush.xpose.msk.msra.mxu0 %vm232_vm0, %v223_v4 }
  0x2d   : > { %400 = vmatpush.xpose.msk.msra.mxu0 %vm232_vm0, %v222_v5 }
  0x31   : > { %401 = vmatpush.xpose.msk.msra.mxu0 %vm232_vm0, %v221_v6 }
  0x35   : > { %402 = vmatpush.xpose.msk.msra.mxu0 %vm232_vm0, %v220_v7 }
  0x39   : > { %403 = vmatpush.xpose.msk.msra.mxu0 %vm232_vm0, %v219_v8 }
  0x3d   : > { %404 = vmatpush.xpose.msk.msra.mxu0 %vm232_vm0, %v218_v9 }
  0x41   : > { %405 = vmatpush.xpose.msk.msra.mxu0 %vm232_vm0, %v217_v10 }
  0x45   : > { %406 = vmatpush.xpose.msk.msra.mxu0 %vm232_vm0, %v216_v11 }
  0x49   : > { %407 = vmatpush.xpose.msk.msra.mxu0 %vm232_vm0, %v215_v12 }
  0x4d   : > { %408 = vmatpush.xpose.msk.msra.mxu0 %vm232_vm0, %v214_v13 }
  0x51   : > { %409 = vmatpush.xpose.msk.msra.mxu0 %vm232_vm0, %v213_v14 }
  0x55   : > { %410 = vmatpush.xpose.msk.msra.mxu0 %vm232_vm0, %v212_v15 }
  0x58   : > { %411 = vmatmul.msk.f32.vlgmr.msra.gmra.mxu0 %vm232_vm0, %v228_v16 }
  0xd5   : > { %v301_v21 = vpop.f32.mrf.mxu0 }
  0xd6   : > { %v302_v22 = vadd.f32 %v301_v21, %v231_v19 }
  0xd8   : > { %v306_v23 = vadd.f32 %v305_v20, %v302_v22 }
  0xda   : > { %v307_v24 = vmul.f32 0.5, %v306_v23 }
  0xdc   : > { %453 = vtanh.f32 %v307_v24 }
  0xe2   : > { %v454_v25 = vpop.eup %453 }
  0xe3   : > { %v309_v26 = vadd.f32 1.0, %v454_v25 }
  0xe5   : > { %v310_v27 = vmul.f32 0.5, %v309_v26 }
  0xe7   : > { %311 = vst [vmem:[%s202_s23] sm:$0x1] %v310_v27 }
  0xe8   : > { %482 = shalt.err (!%p479_p4)
}
  0xe9   : > { %414 = dma.vmem_to_hbm [thread:$0]  (%p585_p5), %s324_s24, 16, %s326_s28, %s313_s29  }
  0xea PF: > { %p420_p7 = scmp.ge.s32.totalorder %s517_s20, 2  ;;  %s337_s10 = sand.u32 1, %s505_s17  }
  0xeb   : > { %s338_s11 = scalar_lea.sflag [#allocation4], %s337_s10 }
  0xec   : > { %p417_p8 = pnand %p420_p7, %p589_p6 }
  0xee   : > { %p418_p9 = pneg %p417_p8 }
  0xf0   : > { %500 = dma.done.wait (%p418_p9), %s338_s11, 16  }
  0xf1   : > { %502 = vsyncadd (%p418_p9), %s338_s11, 4294967280  ;;  %p15_p10 = scmp.ge.s32.totalorder %s572_s22, 4   ;;  %s681_s17 = smov %s509_s18 }
  0xf2   : > { %s682_s18 = smov %s513_s19  ;;  %s683_s19 = smov %s583_s25 }
  0xf3   : > { %s684_s20 = smov %s572_s22  ;;  %17 = sbr.rel (!%p15_p10) target bundleno = 5 (0x5), region = 74 }
  0xf8   :  { %343 = vsyncpa [#allocation4], 1 }
  0xf9   :  { %345 = vsyncpa [#allocation4 + $0x1], 1 }

</bundles_post_ra>
